<compile_context>
chip_gen: v5e
topology: v5e:2x2
jax: 0.10.0
libtpu: 0.0.40
codegen_flags: <defaults>
</compile_context>

<pallas_src>
import functools

import jax
import jax.numpy as jnp
from jax.experimental import pallas as pl
from jax.experimental.pallas import tpu as pltpu

LANES = 128


def _round_up(a, b):
    return ((a + b - 1) // b) * b


def _apply_nonlin(x, nonlin):
    if nonlin == "sigmoid":
        # TODO(synk): if bf16 + sigmoid becomes the hot path on v7x, check the
        # bundle for EUP saturation and switch to an explicit
        # pl.reciprocal(1 + exp(-x), approx=True) formulation.
        return jax.nn.sigmoid(x)
    if nonlin == "relu":
        return jnp.maximum(x, 0.0)
    return x


def _dice_sums_kernel(x_ref, t_ref, oxt_ref, ox_ref, ot_ref, *,
                      nonlin, br, rows, n_inner):
    o = pl.program_id(0)
    i = pl.program_id(1)

    # Fresh (8,128) partial accumulators at the start of each outer slice.
    @pl.when(i == 0)
    def _init():
        oxt_ref[...] = jnp.zeros_like(oxt_ref)
        ox_ref[...] = jnp.zeros_like(ox_ref)
        ot_ref[...] = jnp.zeros_like(ot_ref)

    x = _apply_nonlin(x_ref[...].astype(jnp.float32), nonlin)
    t = t_ref[...].astype(jnp.float32)

    g = o * n_inner + i            # intended global block index (pre-clamp)
    full_blocks = rows // br       # blocks with no ragged rows (static)

    def _accum(xv, tv):
        # (br, 128) -> (8, 128): the leading-axis sum is pure VPU vreg adds;
        # the tiny RMW on the resident output block replaces three full-tile
        # accumulator read-modify-writes per data vreg.
        oxt_ref[...] += (xv * tv).reshape(br // 8, 8, LANES).sum(axis=0)
        ox_ref[...] += xv.reshape(br // 8, 8, LANES).sum(axis=0)
        ot_ref[...] += tv.reshape(br // 8, 8, LANES).sum(axis=0)

    @pl.when(g < full_blocks)
    def _interior():
        # Fully-valid block: no masking / iotas on the hot path.
        _accum(x, t)

    @pl.when(g >= full_blocks)
    def _ragged():
        # Ragged last block or clamped out-of-range virtual block: mask at the
        # row level only.  Garbage rows flow through the nonlinearity before
        # being zeroed here, which is numerically harmless -- do not reorder.
        row = jax.lax.broadcasted_iota(jnp.int32, (br, 1), 0)
        valid = (g * br + row) < rows           # row-level compare: no overflow
        _accum(jnp.where(valid, x, 0.0), jnp.where(valid, t, 0.0))


def dice_loss(inputs, targets, smooth=1.0, nonlin=None,
              block_rows=8192, n_outer=2):
    """Pallas TPU Dice loss matching DiceLoss.forward semantics."""
    assert nonlin in ("sigmoid", "relu", None)
    n = int(inputs.size)
    x = inputs.reshape(-1)
    t = targets.reshape(-1)

    n_main = (n // LANES) * LANES
    rows = n_main // LANES

    # <=127-element tail reduced in plain JAX (avoids a full-array pad copy).
    if n_main != n:
        tx = _apply_nonlin(x[n_main:].astype(jnp.float32), nonlin)
        tt = t[n_main:].astype(jnp.float32)
        tail = (jnp.sum(tx * tt), jnp.sum(tx), jnp.sum(tt))
    else:
        z = jnp.float32(0.0)
        tail = (z, z, z)

    if rows == 0:
        # Nothing for the kernel (covers the empty-input case as well).
        inter, sum_x, sum_t = tail
    else:
        # Free bitcast when n is already a multiple of 128 (typical NCHW).
        xm = x[:n_main].reshape(rows, LANES)
        tm = t[:n_main].reshape(rows, LANES)

        # Keep a multiple of 32 rows so bf16 (16,128) / int8 (32,128) sublane
        # tiling stays legal; clamp to what the data needs.
        br = min(_round_up(max(block_rows, 32), 32), _round_up(rows, 32))
        n_blocks = pl.cdiv(rows, br)
        n_out = max(1, min(n_outer, n_blocks))
        n_inner = pl.cdiv(n_blocks, n_out)
        last_block = n_blocks - 1

        def in_map(o, i):
            # Clamp virtual out-of-range blocks onto the last real block; the
            # in-kernel row mask (based on the *intended* index g) zeroes them.
            return (jnp.minimum(o * n_inner + i, last_block), 0)

        def out_map(o, i):
            return (o, 0)

        bytes_per_elem = (jnp.dtype(inputs.dtype).itemsize
                          + jnp.dtype(targets.dtype).itemsize)
        cost = pl.CostEstimate(
            flops=5 * n,
            transcendentals=n if nonlin == "sigmoid" else 0,
            bytes_accessed=n * bytes_per_elem + 3 * n_out * 8 * LANES * 4,
        )

        out_shape = tuple(
            jax.ShapeDtypeStruct((n_out * 8, LANES), jnp.float32)
            for _ in range(3))

        out_xt, out_x, out_t = pl.pallas_call(
            functools.partial(_dice_sums_kernel, nonlin=nonlin, br=br,
                              rows=rows, n_inner=n_inner),
            out_shape=out_shape,
            grid_spec=pltpu.PrefetchScalarGridSpec(
                num_scalar_prefetch=0,
                grid=(n_out, n_inner),
                in_specs=[
                    pl.BlockSpec((br, LANES), in_map),
                    pl.BlockSpec((br, LANES), in_map),
                ],
                out_specs=[
                    pl.BlockSpec((8, LANES), out_map),
                    pl.BlockSpec((8, LANES), out_map),
                    pl.BlockSpec((8, LANES), out_map),
                ],
            ),
            compiler_params=pltpu.CompilerParams(
                dimension_semantics=("parallel", "arbitrary"),
                vmem_limit_bytes=48 * 1024 * 1024,
            ),
            cost_estimate=cost,
        )(xm, tm)

        inter = jnp.sum(out_xt) + tail[0]
        sum_x = jnp.sum(out_x) + tail[1]
        sum_t = jnp.sum(out_t) + tail[2]

    dice = (2.0 * inter + smooth) / (sum_x + sum_t + smooth)
    return 1.0 - dice


def _dice_loss_ref(inputs, targets, smooth=1.0, nonlin=None):
    x = _apply_nonlin(inputs.astype(jnp.float32), nonlin).reshape(-1)
    t = targets.reshape(-1).astype(jnp.float32)
    inter = jnp.sum(x * t)
    dice = (2.0 * inter + smooth) / (jnp.sum(x) + jnp.sum(t) + smooth)
    return 1.0 - dice


if __name__ == "__main__":
    key = jax.random.PRNGKey(0)

    cases = [
        # (shape, block_rows, dtype)
        ((2, 4, 16, 16), 8192, jnp.float32),   # single block, lane aligned
        ((2, 4, 32, 32), 32,   jnp.float32),   # multi-block, 2-way outer split
        ((2, 4, 48, 16), 32,   jnp.float32),   # ragged last block (rows % br)
        ((2, 3, 16, 16), 8192, jnp.float32),   # rows < min block (masked path)
        ((2, 3, 5, 7),   8192, jnp.float32),   # n % 128 != 0 (JAX tail path)
        ((3, 5, 7),      8192, jnp.float32),   # n < 128 (pure-JAX, no kernel)
        ((2, 4, 16, 16), 8192, jnp.bfloat16),  # narrow-dtype streaming
        ((2, 0, 16, 16), 8192, jnp.float32),   # empty input guard
    ]

    ok = True
    for idx, (shape, brows, dtype) in enumerate(cases):
        k1, k2 = jax.random.split(jax.random.fold_in(key, idx))
        xin = jax.random.normal(k1, shape, dtype=jnp.float32).astype(dtype)
        tgt = (jax.random.uniform(k2, shape) > 0.5).astype(jnp.float32)
        for nonlin in (None, "sigmoid", "relu"):
            out = dice_loss(xin, tgt, smooth=1.0, nonlin=nonlin,
                            block_rows=brows)
            out = jax.block_until_ready(out)
            ref = _dice_loss_ref(xin, tgt, smooth=1.0, nonlin=nonlin)
            if not jnp.allclose(out, ref, atol=1e-5, rtol=1e-5):
                ok = False
                print(f"MISMATCH shape={shape} block_rows={brows} "
                      f"dtype={dtype} nonlin={nonlin}: {out} vs {ref}")

    if ok:
        print("KERNEL_OK")
</pallas_src>

<mosaic_0001>
module attributes {stable_mosaic.version = 11 : i64} {
  func.func @_dice_sums_kernel(%arg0: i32, %arg1: i32, %arg2: memref<32x128xf32, #tpu.memory_space<vmem>>, %arg3: memref<32x128xf32, #tpu.memory_space<vmem>>, %arg4: memref<8x128xf32, #tpu.memory_space<vmem>>, %arg5: memref<8x128xf32, #tpu.memory_space<vmem>>, %arg6: memref<8x128xf32, #tpu.memory_space<vmem>>) attributes {dimension_semantics = [#tpu.dimension_semantics<parallel>, #tpu.dimension_semantics<arbitrary>], iteration_bounds = array<i64: 1, 1>, scalar_prefetch = 0 : i64, scratch_operands = 0 : i64, tpu.core_type = #tpu.core_type<tc>, window_params = [{transform_indices = @transform_0, window_bounds = array<i64: 32, 128>}, {transform_indices = @transform_1, window_bounds = array<i64: 32, 128>}, {transform_indices = @transform_2, window_bounds = array<i64: 8, 128>}, {transform_indices = @transform_3, window_bounds = array<i64: 8, 128>}, {transform_indices = @transform_4, window_bounds = array<i64: 8, 128>}]} {
    %c0_i32 = arith.constant 0 : i32
    %0 = arith.cmpi eq, %arg1, %c0_i32 : i32
    %1 = arith.extui %0 : i1 to i32
    %c0_i32_0 = arith.constant 0 : i32
    %2 = arith.cmpi ne, %1, %c0_i32_0 : i32
    scf.if %2 {
      %cst = arith.constant 0.000000e+00 : f32
      %13 = vector.broadcast %cst : f32 to vector<8x128xf32>
      %c0_8 = arith.constant 0 : index
      %c0_9 = arith.constant 0 : index
      %14 = vector.load %arg4[%c0_8, %c0_9] : memref<8x128xf32, #tpu.memory_space<vmem>>, vector<8x128xf32>
      tpu.vector_store %arg4[%c0_8, %c0_9], %13 {strides = array<i32>} : memref<8x128xf32, #tpu.memory_space<vmem>>, vector<8x128xf32>,
      %cst_10 = arith.constant 0.000000e+00 : f32
      %15 = vector.broadcast %cst_10 : f32 to vector<8x128xf32>
      %c0_11 = arith.constant 0 : index
      %c0_12 = arith.constant 0 : index
      %16 = vector.load %arg5[%c0_11, %c0_12] : memref<8x128xf32, #tpu.memory_space<vmem>>, vector<8x128xf32>
      tpu.vector_store %arg5[%c0_11, %c0_12], %15 {strides = array<i32>} : memref<8x128xf32, #tpu.memory_space<vmem>>, vector<8x128xf32>,
      %cst_13 = arith.constant 0.000000e+00 : f32
      %17 = vector.broadcast %cst_13 : f32 to vector<8x128xf32>
      %c0_14 = arith.constant 0 : index
      %c0_15 = arith.constant 0 : index
      %18 = vector.load %arg6[%c0_14, %c0_15] : memref<8x128xf32, #tpu.memory_space<vmem>>, vector<8x128xf32>
      tpu.vector_store %arg6[%c0_14, %c0_15], %17 {strides = array<i32>} : memref<8x128xf32, #tpu.memory_space<vmem>>, vector<8x128xf32>,
    } else {
    }
    %c0 = arith.constant 0 : index
    %c0_1 = arith.constant 0 : index
    %3 = vector.load %arg2[%c0, %c0_1] : memref<32x128xf32, #tpu.memory_space<vmem>>, vector<32x128xf32>
    %c0_2 = arith.constant 0 : index
    %c0_3 = arith.constant 0 : index
    %4 = vector.load %arg3[%c0_2, %c0_3] : memref<32x128xf32, #tpu.memory_space<vmem>>, vector<32x128xf32>
    %c1_i32 = arith.constant 1 : i32
    %5 = arith.muli %arg0, %c1_i32 : i32
    %6 = arith.addi %5, %arg1 : i32
    %c0_i32_4 = arith.constant 0 : i32
    %7 = arith.cmpi slt, %6, %c0_i32_4 : i32
    %8 = arith.extui %7 : i1 to i32
    %c0_i32_5 = arith.constant 0 : i32
    %9 = arith.cmpi ne, %8, %c0_i32_5 : i32
    scf.if %9 {
      %c0_8 = arith.constant 0 : index
      %c0_9 = arith.constant 0 : index
      %13 = vector.load %arg4[%c0_8, %c0_9] : memref<8x128xf32, #tpu.memory_space<vmem>>, vector<8x128xf32>
      %14 = arith.mulf %3, %4 : vector<32x128xf32>
      %15 = vector.shape_cast %14 : vector<32x128xf32> to vector<4x8x128xf32>
      %cst = arith.constant dense<0.000000e+00> : vector<8x128xf32>
      %16 = vector.multi_reduction <add>, %15, %cst [0] : vector<4x8x128xf32> to vector<8x128xf32>
      %17 = arith.addf %13, %16 : vector<8x128xf32>
      %c0_10 = arith.constant 0 : index
      %c0_11 = arith.constant 0 : index
      %18 = vector.load %arg4[%c0_10, %c0_11] : memref<8x128xf32, #tpu.memory_space<vmem>>, vector<8x128xf32>
      tpu.vector_store %arg4[%c0_10, %c0_11], %17 {strides = array<i32>} : memref<8x128xf32, #tpu.memory_space<vmem>>, vector<8x128xf32>,
      %c0_12 = arith.constant 0 : index
      %c0_13 = arith.constant 0 : index
      %19 = vector.load %arg5[%c0_12, %c0_13] : memref<8x128xf32, #tpu.memory_space<vmem>>, vector<8x128xf32>
      %20 = vector.shape_cast %3 : vector<32x128xf32> to vector<4x8x128xf32>
      %cst_14 = arith.constant dense<0.000000e+00> : vector<8x128xf32>
      %21 = vector.multi_reduction <add>, %20, %cst_14 [0] : vector<4x8x128xf32> to vector<8x128xf32>
      %22 = arith.addf %19, %21 : vector<8x128xf32>
      %c0_15 = arith.constant 0 : index
      %c0_16 = arith.constant 0 : index
      %23 = vector.load %arg5[%c0_15, %c0_16] : memref<8x128xf32, #tpu.memory_space<vmem>>, vector<8x128xf32>
      tpu.vector_store %arg5[%c0_15, %c0_16], %22 {strides = array<i32>} : memref<8x128xf32, #tpu.memory_space<vmem>>, vector<8x128xf32>,
      %c0_17 = arith.constant 0 : index
      %c0_18 = arith.constant 0 : index
      %24 = vector.load %arg6[%c0_17, %c0_18] : memref<8x128xf32, #tpu.memory_space<vmem>>, vector<8x128xf32>
      %25 = vector.shape_cast %4 : vector<32x128xf32> to vector<4x8x128xf32>
      %cst_19 = arith.constant dense<0.000000e+00> : vector<8x128xf32>
      %26 = vector.multi_reduction <add>, %25, %cst_19 [0] : vector<4x8x128xf32> to vector<8x128xf32>
      %27 = arith.addf %24, %26 : vector<8x128xf32>
      %c0_20 = arith.constant 0 : index
      %c0_21 = arith.constant 0 : index
      %28 = vector.load %arg6[%c0_20, %c0_21] : memref<8x128xf32, #tpu.memory_space<vmem>>, vector<8x128xf32>
      tpu.vector_store %arg6[%c0_20, %c0_21], %27 {strides = array<i32>} : memref<8x128xf32, #tpu.memory_space<vmem>>, vector<8x128xf32>,
    } else {
    }
    %c0_i32_6 = arith.constant 0 : i32
    %10 = arith.cmpi sge, %6, %c0_i32_6 : i32
    %11 = arith.extui %10 : i1 to i32
    %c0_i32_7 = arith.constant 0 : i32
    %12 = arith.cmpi ne, %11, %c0_i32_7 : i32
    scf.if %12 {
      %13 = tpu.iota {dimensions = array<i32: 0>} : vector<32x1xi32>
      %c32_i32 = arith.constant 32 : i32
      %14 = arith.muli %6, %c32_i32 : i32
      %15 = vector.broadcast %14 : i32 to vector<32x1xi32>
      %16 = arith.addi %15, %13 : vector<32x1xi32>
      %c16_i32 = arith.constant 16 : i32
      %17 = vector.broadcast %c16_i32 : i32 to vector<32x1xi32>
      %18 = arith.cmpi slt, %16, %17 : vector<32x1xi32>
      %cst = arith.constant 0.000000e+00 : f32
      %19 = vector.shape_cast %18 : vector<32x1xi1> to vector<32x1xi1>
      %20 = vector.broadcast %19 : vector<32x1xi1> to vector<32x128xi1>
      %21 = vector.broadcast %cst : f32 to vector<32x128xf32>
      %22 = arith.select %20, %3, %21 : vector<32x128xi1>, vector<32x128xf32>
      %cst_8 = arith.constant 0.000000e+00 : f32
      %23 = vector.shape_cast %18 : vector<32x1xi1> to vector<32x1xi1>
      %24 = vector.broadcast %23 : vector<32x1xi1> to vector<32x128xi1>
      %25 = vector.broadcast %cst_8 : f32 to vector<32x128xf32>
      %26 = arith.select %24, %4, %25 : vector<32x128xi1>, vector<32x128xf32>
      %c0_9 = arith.constant 0 : index
      %c0_10 = arith.constant 0 : index
      %27 = vector.load %arg4[%c0_9, %c0_10] : memref<8x128xf32, #tpu.memory_space<vmem>>, vector<8x128xf32>
      %28 = arith.mulf %22, %26 : vector<32x128xf32>
      %29 = vector.shape_cast %28 : vector<32x128xf32> to vector<4x8x128xf32>
      %cst_11 = arith.constant dense<0.000000e+00> : vector<8x128xf32>
      %30 = vector.multi_reduction <add>, %29, %cst_11 [0] : vector<4x8x128xf32> to vector<8x128xf32>
      %31 = arith.addf %27, %30 : vector<8x128xf32>
      %c0_12 = arith.constant 0 : index
      %c0_13 = arith.constant 0 : index
      %32 = vector.load %arg4[%c0_12, %c0_13] : memref<8x128xf32, #tpu.memory_space<vmem>>, vector<8x128xf32>
      tpu.vector_store %arg4[%c0_12, %c0_13], %31 {strides = array<i32>} : memref<8x128xf32, #tpu.memory_space<vmem>>, vector<8x128xf32>,
      %c0_14 = arith.constant 0 : index
      %c0_15 = arith.constant 0 : index
      %33 = vector.load %arg5[%c0_14, %c0_15] : memref<8x128xf32, #tpu.memory_space<vmem>>, vector<8x128xf32>
      %34 = vector.shape_cast %22 : vector<32x128xf32> to vector<4x8x128xf32>
      %cst_16 = arith.constant dense<0.000000e+00> : vector<8x128xf32>
      %35 = vector.multi_reduction <add>, %34, %cst_16 [0] : vector<4x8x128xf32> to vector<8x128xf32>
      %36 = arith.addf %33, %35 : vector<8x128xf32>
      %c0_17 = arith.constant 0 : index
      %c0_18 = arith.constant 0 : index
      %37 = vector.load %arg5[%c0_17, %c0_18] : memref<8x128xf32, #tpu.memory_space<vmem>>, vector<8x128xf32>
      tpu.vector_store %arg5[%c0_17, %c0_18], %36 {strides = array<i32>} : memref<8x128xf32, #tpu.memory_space<vmem>>, vector<8x128xf32>,
      %c0_19 = arith.constant 0 : index
      %c0_20 = arith.constant 0 : index
      %38 = vector.load %arg6[%c0_19, %c0_20] : memref<8x128xf32, #tpu.memory_space<vmem>>, vector<8x128xf32>
      %39 = vector.shape_cast %26 : vector<32x128xf32> to vector<4x8x128xf32>
      %cst_21 = arith.constant dense<0.000000e+00> : vector<8x128xf32>
      %40 = vector.multi_reduction <add>, %39, %cst_21 [0] : vector<4x8x128xf32> to vector<8x128xf32>
      %41 = arith.addf %38, %40 : vector<8x128xf32>
      %c0_22 = arith.constant 0 : index
      %c0_23 = arith.constant 0 : index
      %42 = vector.load %arg6[%c0_22, %c0_23] : memref<8x128xf32, #tpu.memory_space<vmem>>, vector<8x128xf32>
      tpu.vector_store %arg6[%c0_22, %c0_23], %41 {strides = array<i32>} : memref<8x128xf32, #tpu.memory_space<vmem>>, vector<8x128xf32>,
    } else {
    }
    return
  }
  func.func @transform_0(%arg0: i32, %arg1: i32) -> (i32, i32) {
    %c1_i32 = arith.constant 1 : i32
    %0 = arith.muli %arg0, %c1_i32 : i32
    %1 = arith.addi %0, %arg1 : i32
    %c0_i32 = arith.constant 0 : i32
    %2 = arith.minsi %1, %c0_i32 : i32
    %c0_i32_0 = arith.constant 0 : i32
    %c0_i32_1 = arith.constant 0 : i32
    return %2, %c0_i32_0 : i32, i32
  }
  func.func @transform_1(%arg0: i32, %arg1: i32) -> (i32, i32) {
    %c1_i32 = arith.constant 1 : i32
    %0 = arith.muli %arg0, %c1_i32 : i32
    %1 = arith.addi %0, %arg1 : i32
    %c0_i32 = arith.constant 0 : i32
    %2 = arith.minsi %1, %c0_i32 : i32
    %c0_i32_0 = arith.constant 0 : i32
    %c0_i32_1 = arith.constant 0 : i32
    return %2, %c0_i32_0 : i32, i32
  }
  func.func @transform_2(%arg0: i32, %arg1: i32) -> (i32, i32) {
    %c0_i32 = arith.constant 0 : i32
    %c0_i32_0 = arith.constant 0 : i32
    return %arg0, %c0_i32 : i32, i32
  }
  func.func @transform_3(%arg0: i32, %arg1: i32) -> (i32, i32) {
    %c0_i32 = arith.constant 0 : i32
    %c0_i32_0 = arith.constant 0 : i32
    return %arg0, %c0_i32 : i32, i32
  }
  func.func @transform_4(%arg0: i32, %arg1: i32) -> (i32, i32) {
    %c0_i32 = arith.constant 0 : i32
    %c0_i32_0 = arith.constant 0 : i32
    return %arg0, %c0_i32 : i32, i32
  }
}

</mosaic_0001>

<bundles_post_ra>
// kernel: tpu_custom_call.1
= control target key start
LH: loop header
LB: loop body
LE: loop exit
PB: predicated region body
PF: predicated region fallthrough
CT: control target
= control target key end

     0   :  { %10 = vsyncpa [#allocation3], 0  ;;  %s417_s0 = inlined_call_operand.hbm [shape: f32[16,128], index: 0, kind: input, shape index: {}]   ;;  %s418_s1 = inlined_call_operand.hbm [shape: f32[16,128], index: 1, kind: input, shape index: {}]   ;;  %s419_s2 = inlined_call_operand.hbm [shape: f32[8,128], index: 2, kind: output, shape index: {0}]   ;;  %s420_s3 = inlined_call_operand.hbm [shape: f32[8,128], index: 3, kind: output, shape index: {1}]   ;;  %s421_s4 = inlined_call_operand.hbm [shape: f32[8,128], index: 4, kind: output, shape index: {2}]  }
   0x1   :  { %11 = vsyncpa [#allocation6], 0 }
   0x2   :  { %12 = vsyncpa [#allocation4], 0 }
   0x3   :  { %13 = vsyncpa [#allocation9], 0 }
   0x4   :  { %24 = vsyncadd [#allocation3], 256  ;;  %s29_s17 = sshll.u32 %s417_s0, 4  ;;  %s370_s18 = smov [#allocation2]   ;;  %s30_s17 = int_to_ptr.hbm [resolvable:$true] %s29_s17 }
   0x5   :  { %s31_s19 = sshll.u32 %s370_s18, 4  ;;  %s371_s20 = smov 128   ;;  %s32_s19 = int_to_ptr.vmem [resolvable:$true] %s31_s19 }
   0x6   :  { %s372_s21 = smov 8  }
   0x7   :  { %37 = dma.hbm_to_vmem [thread:$0]  %s30_s17, 256, %s32_s19, [#allocation3], %s371_s20, %s371_s20, %s372_s21  }
   0x8   :  { %48 = vsyncadd [#allocation6], 256  ;;  %s53_s24 = sshll.u32 %s418_s1, 4  ;;  %s373_s25 = smov [#allocation5]   ;;  %s54_s24 = int_to_ptr.hbm [resolvable:$true] %s53_s24 }
   0x9   :  { %s55_s26 = sshll.u32 %s373_s25, 4  ;;  %s56_s26 = int_to_ptr.vmem [resolvable:$true] %s55_s26 }
   0xa   :  { %61 = dma.hbm_to_vmem [thread:$0]  %s54_s24, 256, %s56_s26, [#allocation6], %s371_s20, %s371_s20, %s372_s21  }
   0xb   :  { %362 = dma.done.wait [#allocation3], 512  }
   0xc   :  { %363 = vsyncadd [#allocation3], 4294966784 }
   0xd   :  { %364 = dma.done.wait [#allocation6], 512  }
   0xe   :  { %365 = vsyncadd [#allocation6], 4294966784  ;;  %v89_v0 = vld [vmem:[#allocation2] sm:$0xff]  ;;  %v90_v1 = vld [vmem:[#allocation2 + $0x8] sm:$0xff]  ;;  %s374_s0 = smov [#allocation8]   ;;  %s199_s30 = sshll.u32 %s420_s3, 4  ;;  %s200_s30 = int_to_ptr.hbm [resolvable:$true] %s199_s30 }
   0xf   :  { %v93_v2 = vld [vmem:[#allocation5] sm:$0xff]  ;;  %s197_s27 = sshll.u32 %s374_s0, 4  ;;  %v170_v3 = vadd.f32 %v90_v1, %v89_v0  ;;  %v94_v4 = vld [vmem:[#allocation5 + $0x8] sm:$0xff]  ;;  %s375_s1 = smov [#allocation10]   ;;  %s198_s27 = int_to_ptr.vmem [resolvable:$true] %s197_s27 }
  0x10   :  { %v160_v5 = vmul.f32 %v93_v2, %v89_v0  ;;  %s208_s5 = sshll.u32 %s375_s1, 4  ;;  %s210_s8 = sshll.u32 %s421_s4, 4  ;;  %v161_v6 = vmul.f32 %v94_v4, %v90_v1  ;;  %v176_v7 = vadd.f32 %v94_v4, %v93_v2  ;;  %s209_s5 = int_to_ptr.vmem [resolvable:$true] %s208_s5  ;;  %s211_s8 = int_to_ptr.hbm [resolvable:$true] %s210_s8 }
  0x11   :  { %s376_s9 = smov [#allocation7]   ;;  %s188_s13 = sshll.u32 %s419_s2, 4  ;;  %174 = vst [vmem:[#allocation8] sm:$0xff] %v170_v3  ;;  %s189_s13 = int_to_ptr.hbm [resolvable:$true] %s188_s13 }
  0x12   :  { %s186_s10 = sshll.u32 %s376_s9, 4  ;;  %v164_v8 = vadd.f32 %v161_v6, %v160_v5  ;;  %180 = vst [vmem:[#allocation10] sm:$0xff] %v176_v7  ;;  %s187_s10 = int_to_ptr.vmem [resolvable:$true] %s186_s10 }
  0x13   :  { %202 = dma.vmem_to_hbm [thread:$0]  %s198_s27, 128, %s200_s30, [#allocation9]  }
  0x14   :  { %213 = dma.vmem_to_hbm [thread:$0]  %s209_s5, 128, %s211_s8, [#allocation9]   ;;  %168 = vst [vmem:[#allocation7] sm:$0xff] %v164_v8 }
  0x15   :  { %191 = dma.vmem_to_hbm [thread:$0]  %s187_s10, 128, %s189_s13, [#allocation4]  }
  0x16   :  { %366 = dma.done.wait [#allocation4], 128  }
  0x17   :  { %367 = vsyncadd [#allocation4], 4294967168 }
  0x18   :  { %368 = dma.done.wait [#allocation9], 256  }
  0x19   :  { %369 = vsyncadd [#allocation9], 4294967040 }
  0x1a   :  { %226 = vsyncpa [#allocation3], 1 }
  0x1b   :  { %227 = vsyncpa [#allocation6], 1 }
  0x1c   :  { %228 = vsyncpa [#allocation4], 1 }
  0x1d   :  { %229 = vsyncpa [#allocation9], 1 }

</bundles_post_ra>
